<compile_context>
chip_gen: v6e
topology: v6e:2x2x1
jax: 0.10.0
libtpu: 0.0.40
codegen_flags: <defaults>
</compile_context>

<pallas_src>
import jax
import jax.numpy as jnp
import numpy as np
from jax.experimental import pallas as pl
from jax.experimental.pallas import tpu as pltpu


def _round_up(x, m):
    return ((x + m - 1) // m) * m


# ----------------------------------------------------------------------------- kernel ----- #
def gaussian_backend_kernel(xt_ref, w_ref, b_ref, a_ref, v_ref, c_ref, out_ref):
    """Feature-major tile: xt_ref [2*xvec, T]; out_ref [1, T] (lane-dense scores)."""
    eps2 = 1e-24  # (1e-12)^2 — F.normalize default eps, squared (for the rsqrt form)
    d2 = w_ref.shape[0]
    L = d2 // 2

    # centering_and_LDA on both sides at once: y^T = W_blk @ x12^T + [b; b]   -> [2L, T]
    yt = jnp.dot(w_ref[...], xt_ref[...], preferred_element_type=jnp.float32) + b_ref[...]

    # F.normalize(p=2, dim=1) per half: y / max(||y||, eps) == y * rsqrt(max(||y||^2, eps^2)).
    # Halves are aligned sublane slices; norms are cheap sublane reductions -> [1, T] rows.
    y_top = yt[:L, :]
    y_bot = yt[L:, :]
    inv1 = jax.lax.rsqrt(jnp.maximum(jnp.sum(y_top * y_top, axis=0, keepdims=True), eps2))
    inv2 = jax.lax.rsqrt(jnp.maximum(jnp.sum(y_bot * y_bot, axis=0, keepdims=True), eps2))
    xt = jnp.concatenate([y_top * inv1, y_bot * inv2], axis=0)          # [2L, T]

    # Folded target/non-target score, transposed form:
    #   S^T = sum_features( x^T * (A^T x^T + v) ) + c                   -> [1, T]
    xat = jnp.dot(a_ref[...], xt, preferred_element_type=jnp.float32) + v_ref[...]
    out_ref[...] = jnp.sum(xt * xat, axis=0, keepdims=True) + c_ref[...]


# ------------------------------------------------------------------- parameter packing ----- #
def prepare_gaussian_backend_params(lda_weight, lda_bias, mu_t, cinv_t, mu_nt, cinv_nt):
    """Fold & pack module parameters (float64 on host, cast to f32). Call once at load time.

    lda_weight: [L, xvec] (nn.Linear weight), lda_bias: [L]
    mu_*: [2L], cinv_*: [2L, 2L]
    """
    W = np.asarray(lda_weight, np.float64)
    b = np.asarray(lda_bias, np.float64).reshape(-1)
    mt = np.asarray(mu_t, np.float64).reshape(-1)
    Ct = np.asarray(cinv_t, np.float64)
    mn = np.asarray(mu_nt, np.float64).reshape(-1)
    Cn = np.asarray(cinv_nt, np.float64)

    L, xdim = W.shape
    d2 = 2 * L

    # Block-diagonal LDA applied from the left in feature-major layout: y^T = W_blk x12^T + b2.
    w_blk = np.zeros((d2, 2 * xdim), np.float64)
    w_blk[:L, :xdim] = W
    w_blk[L:, xdim:] = W
    b2 = np.concatenate([b, b]).reshape(d2, 1)

    # Fold the two quadratic forms (Cinv matrices are NOT assumed symmetric):
    #   S = x A x^T + x v + c with A = Cnt - Ct,
    #   v = (Ct + Ct^T) mu_t - (Cnt + Cnt^T) mu_nt,  c = mu_nt Cnt mu_nt - mu_t Ct mu_t.
    a_t = (Cn - Ct).T                                                   # pass A^T (left-apply)
    v_col = ((Ct + Ct.T) @ mt - (Cn + Cn.T) @ mn).reshape(d2, 1)
    c_val = np.asarray(mn @ Cn @ mn - mt @ Ct @ mt).reshape(1, 1)

    f32 = lambda a: jnp.asarray(a, jnp.float32)
    return dict(w_blk=f32(w_blk), b2=f32(b2), a_t=f32(a_t), v=f32(v_col), c=f32(c_val))


# ------------------------------------------------------------------------------ wrapper ----- #
def gaussian_backend(x1, x2, params, *, tile_b=8192):
    B, xdim = x1.shape
    w_blk, b2, a_t, v, c = params["w_blk"], params["b2"], params["a_t"], params["v"], params["c"]
    d2, d2x = w_blk.shape
    assert d2x == 2 * xdim, "LDA weight does not match xvector dim"

    # Lane-dense tiling: tile_b is a multiple of 128; batch padded to a multiple of tile_b.
    tile_b = max(128, min(int(tile_b), _round_up(B, 128)))
    tile_b = _round_up(tile_b, 128)
    B_pad = _round_up(B, tile_b)
    grid = (B_pad // tile_b,)

    # Wrapper-side packing: x12^T = [x1 | x2]^T, zero-padded columns for the ragged tail.
    # (Padded columns give y = b -> finite norm via the eps clamp; trimmed after the call.)
    x12_t = jnp.concatenate([x1.astype(jnp.float32), x2.astype(jnp.float32)], axis=1).T
    if B_pad != B:
        x12_t = jnp.pad(x12_t, ((0, 0), (0, B_pad - B)))

    flops = 2 * B_pad * d2 * d2x + 2 * B_pad * d2 * d2 + 8 * B_pad * d2
    bytes_accessed = 4 * (d2x * B_pad + B_pad + d2 * d2x + d2 * d2 + 3 * d2 + 1)

    out = pl.pallas_call(
        gaussian_backend_kernel,
        out_shape=jax.ShapeDtypeStruct((1, B_pad), jnp.float32),
        grid=grid,
        in_specs=[
            pl.BlockSpec((d2x, tile_b), lambda i: (0, i)),   # packed pair tile (feature-major)
            pl.BlockSpec((d2, d2x), lambda i: (0, 0)),       # W_blk (VMEM-resident)
            pl.BlockSpec((d2, 1), lambda i: (0, 0)),         # [b; b]
            pl.BlockSpec((d2, d2), lambda i: (0, 0)),        # A^T
            pl.BlockSpec((d2, 1), lambda i: (0, 0)),         # v
            pl.BlockSpec((1, 1), lambda i: (0, 0)),          # c
        ],
        out_specs=pl.BlockSpec((1, tile_b), lambda i: (0, i)),
        compiler_params=pltpu.CompilerParams(
            dimension_semantics=("parallel",),
            vmem_limit_bytes=48 * 1024 * 1024,
        ),
        cost_estimate=pl.CostEstimate(
            flops=flops, transcendentals=2 * B_pad, bytes_accessed=bytes_accessed),
    )(x12_t, w_blk, b2, a_t, v, c)

    return out[0, :B]  # -> shape (B,), matching the torch forward


# ---------------------------------------------------------------------------- reference ----- #
def reference(x1, x2, lda_w, lda_b, mu_t, cinv_t, mu_nt, cinv_nt):
    """Direct jnp translation of the PyTorch forward (unfolded), to validate the fold."""
    eps = 1e-12
    y1 = x1 @ lda_w.T + lda_b
    y2 = x2 @ lda_w.T + lda_b
    y1 = y1 / jnp.maximum(jnp.linalg.norm(y1, axis=1, keepdims=True), eps)
    y2 = y2 / jnp.maximum(jnp.linalg.norm(y2, axis=1, keepdims=True), eps)
    x = jnp.concatenate([y1, y2], axis=1)
    dt = x - mu_t
    dnt = x - mu_nt
    St = -jnp.sum((dt @ cinv_t) * dt, axis=1)
    Snt = -jnp.sum((dnt @ cinv_nt) * dnt, axis=1)
    return St - Snt


if __name__ == "__main__":
    # Small config consistent with the module: nc.xvector_dim, nc.layer1_LDA_dim.
    B = 256
    xvector_dim = 32
    lda_dim = 16
    d2 = 2 * lda_dim

    key = jax.random.PRNGKey(0)
    ks = jax.random.split(key, 8)

    x1 = jax.random.normal(ks[0], (B, xvector_dim), dtype=jnp.float32)
    x2 = jax.random.normal(ks[1], (B, xvector_dim), dtype=jnp.float32)

    # nn.Linear(xvector_dim, lda_dim): weight [lda_dim, xvector_dim], bias [lda_dim]
    lda_w = jax.random.normal(ks[2], (lda_dim, xvector_dim), dtype=jnp.float32) * 0.1
    lda_b = jax.random.normal(ks[3], (lda_dim,), dtype=jnp.float32) * 0.1

    # torch.rand(...) analogues (uniform [0, 1))
    mu_t = jax.random.uniform(ks[4], (d2,), dtype=jnp.float32)
    cinv_t = jax.random.uniform(ks[5], (d2, d2), dtype=jnp.float32)
    mu_nt = jax.random.uniform(ks[6], (d2,), dtype=jnp.float32)
    cinv_nt = jax.random.uniform(ks[7], (d2, d2), dtype=jnp.float32)

    params = prepare_gaussian_backend_params(lda_w, lda_b, mu_t, cinv_t, mu_nt, cinv_nt)

    # tile_b=128 -> grid of 2 batch tiles (exercises pipelining / the parallel axis at small B).
    S = gaussian_backend(x1, x2, params, tile_b=128)
    S = jax.block_until_ready(S)

    S_ref = reference(x1, x2, lda_w, lda_b, mu_t, cinv_t, mu_nt, cinv_nt)
    assert S.shape == (B,)
    assert jnp.allclose(S, S_ref, atol=1e-3, rtol=1e-3), float(jnp.max(jnp.abs(S - S_ref)))

    print("KERNEL_OK")
</pallas_src>

<mosaic_0001>
module attributes {stable_mosaic.version = 11 : i64} {
  func.func @gaussian_backend_kernel(%arg0: i32, %arg1: memref<64x128xf32, #tpu.memory_space<vmem>>, %arg2: memref<32x64xf32, #tpu.memory_space<vmem>>, %arg3: memref<32x1xf32, #tpu.memory_space<vmem>>, %arg4: memref<32x32xf32, #tpu.memory_space<vmem>>, %arg5: memref<32x1xf32, #tpu.memory_space<vmem>>, %arg6: memref<1x1xf32, #tpu.memory_space<vmem>>, %arg7: memref<1x128xf32, #tpu.memory_space<vmem>>) attributes {dimension_semantics = [#tpu.dimension_semantics<parallel>], iteration_bounds = array<i64: 2>, scalar_prefetch = 0 : i64, scratch_operands = 0 : i64, tpu.core_type = #tpu.core_type<tc>, window_params = [{transform_indices = @transform_0, window_bounds = array<i64: 64, 128>}, {pipeline_mode = #tpu.pipeline_mode<synchronous>, transform_indices = @transform_1, window_bounds = array<i64: 32, 64>}, {pipeline_mode = #tpu.pipeline_mode<synchronous>, transform_indices = @transform_2, window_bounds = array<i64: 32, 1>}, {pipeline_mode = #tpu.pipeline_mode<synchronous>, transform_indices = @transform_3, window_bounds = array<i64: 32, 32>}, {pipeline_mode = #tpu.pipeline_mode<synchronous>, transform_indices = @transform_4, window_bounds = array<i64: 32, 1>}, {pipeline_mode = #tpu.pipeline_mode<synchronous>, transform_indices = @transform_5, window_bounds = array<i64: 1, 1>}, {transform_indices = @transform_6, window_bounds = array<i64: 1, 128>}]} {
    %c0 = arith.constant 0 : index
    %c0_0 = arith.constant 0 : index
    %0 = vector.load %arg2[%c0, %c0_0] : memref<32x64xf32, #tpu.memory_space<vmem>>, vector<32x64xf32>
    %c0_1 = arith.constant 0 : index
    %c0_2 = arith.constant 0 : index
    %1 = vector.load %arg1[%c0_1, %c0_2] : memref<64x128xf32, #tpu.memory_space<vmem>>, vector<64x128xf32>
    %cst = arith.constant dense<0.000000e+00> : vector<32x128xf32>
    %2 = tpu.matmul %0, %1, %cst {dimension_numbers = #tpu.dot_dimension_numbers<[1], [0], [0], [1], [0, 0, 1, 1], [], []>} : vector<32x64xf32>, vector<64x128xf32>, vector<32x128xf32> -> vector<32x128xf32>
    %c0_3 = arith.constant 0 : index
    %c0_4 = arith.constant 0 : index
    %3 = vector.load %arg3[%c0_3, %c0_4] : memref<32x1xf32, #tpu.memory_space<vmem>>, vector<32x1xf32>
    %4 = vector.broadcast %3 : vector<32x1xf32> to vector<32x128xf32>
    %5 = arith.addf %2, %4 : vector<32x128xf32>
    %6 = vector.extract_strided_slice %5 {offsets = [0, 0], sizes = [16, 128], strides = [1, 1]} : vector<32x128xf32> to vector<16x128xf32>
    %7 = vector.extract_strided_slice %5 {offsets = [16, 0], sizes = [16, 128], strides = [1, 1]} : vector<32x128xf32> to vector<16x128xf32>
    %8 = arith.mulf %6, %6 : vector<16x128xf32>
    %cst_5 = arith.constant dense<0.000000e+00> : vector<128xf32>
    %9 = vector.multi_reduction <add>, %8, %cst_5 [0] : vector<16x128xf32> to vector<128xf32>
    %10 = vector.shape_cast %9 : vector<128xf32> to vector<1x128xf32>
    %cst_6 = arith.constant 1.000000e-24 : f32
    %11 = vector.broadcast %cst_6 : f32 to vector<1x128xf32>
    %12 = arith.maximumf %10, %11 : vector<1x128xf32>
    %13 = math.rsqrt %12 : vector<1x128xf32>
    %14 = arith.mulf %7, %7 : vector<16x128xf32>
    %cst_7 = arith.constant dense<0.000000e+00> : vector<128xf32>
    %15 = vector.multi_reduction <add>, %14, %cst_7 [0] : vector<16x128xf32> to vector<128xf32>
    %16 = vector.shape_cast %15 : vector<128xf32> to vector<1x128xf32>
    %cst_8 = arith.constant 1.000000e-24 : f32
    %17 = vector.broadcast %cst_8 : f32 to vector<1x128xf32>
    %18 = arith.maximumf %16, %17 : vector<1x128xf32>
    %19 = math.rsqrt %18 : vector<1x128xf32>
    %20 = vector.broadcast %13 : vector<1x128xf32> to vector<16x128xf32>
    %21 = arith.mulf %6, %20 : vector<16x128xf32>
    %22 = vector.broadcast %19 : vector<1x128xf32> to vector<16x128xf32>
    %23 = arith.mulf %7, %22 : vector<16x128xf32>
    %24 = tpu.concatenate %21, %23 in 0 : vector<16x128xf32>, vector<16x128xf32> -> vector<32x128xf32>
    %c0_9 = arith.constant 0 : index
    %c0_10 = arith.constant 0 : index
    %25 = vector.load %arg4[%c0_9, %c0_10] : memref<32x32xf32, #tpu.memory_space<vmem>>, vector<32x32xf32>
    %cst_11 = arith.constant dense<0.000000e+00> : vector<32x128xf32>
    %26 = tpu.matmul %25, %24, %cst_11 {dimension_numbers = #tpu.dot_dimension_numbers<[1], [0], [0], [1], [0, 0, 1, 1], [], []>} : vector<32x32xf32>, vector<32x128xf32>, vector<32x128xf32> -> vector<32x128xf32>
    %c0_12 = arith.constant 0 : index
    %c0_13 = arith.constant 0 : index
    %27 = vector.load %arg5[%c0_12, %c0_13] : memref<32x1xf32, #tpu.memory_space<vmem>>, vector<32x1xf32>
    %28 = vector.broadcast %27 : vector<32x1xf32> to vector<32x128xf32>
    %29 = arith.addf %26, %28 : vector<32x128xf32>
    %30 = arith.mulf %24, %29 : vector<32x128xf32>
    %cst_14 = arith.constant dense<0.000000e+00> : vector<128xf32>
    %31 = vector.multi_reduction <add>, %30, %cst_14 [0] : vector<32x128xf32> to vector<128xf32>
    %32 = vector.shape_cast %31 : vector<128xf32> to vector<1x128xf32>
    %c0_15 = arith.constant 0 : index
    %c0_16 = arith.constant 0 : index
    %33 = vector.load %arg6[%c0_15, %c0_16] : memref<1x1xf32, #tpu.memory_space<vmem>>, vector<1x1xf32>
    %34 = vector.broadcast %33 : vector<1x1xf32> to vector<1x128xf32>
    %35 = arith.addf %32, %34 : vector<1x128xf32>
    %c0_17 = arith.constant 0 : index
    %c0_18 = arith.constant 0 : index
    %36 = vector.load %arg7[%c0_17, %c0_18] : memref<1x128xf32, #tpu.memory_space<vmem>>, vector<1x128xf32>
    tpu.vector_store %arg7[%c0_17, %c0_18], %35 {strides = array<i32>} : memref<1x128xf32, #tpu.memory_space<vmem>>, vector<1x128xf32>,
    return
  }
  func.func @transform_0(%arg0: i32) -> (i32, i32) {
    %c0_i32 = arith.constant 0 : i32
    %c0_i32_0 = arith.constant 0 : i32
    return %c0_i32, %arg0 : i32, i32
  }
  func.func @transform_1(%arg0: i32) -> (i32, i32) {
    %c0_i32 = arith.constant 0 : i32
    %c0_i32_0 = arith.constant 0 : i32
    %c0_i32_1 = arith.constant 0 : i32
    return %c0_i32, %c0_i32_0 : i32, i32
  }
  func.func @transform_2(%arg0: i32) -> (i32, i32) {
    %c0_i32 = arith.constant 0 : i32
    %c0_i32_0 = arith.constant 0 : i32
    %c0_i32_1 = arith.constant 0 : i32
    return %c0_i32, %c0_i32_0 : i32, i32
  }
  func.func @transform_3(%arg0: i32) -> (i32, i32) {
    %c0_i32 = arith.constant 0 : i32
    %c0_i32_0 = arith.constant 0 : i32
    %c0_i32_1 = arith.constant 0 : i32
    return %c0_i32, %c0_i32_0 : i32, i32
  }
  func.func @transform_4(%arg0: i32) -> (i32, i32) {
    %c0_i32 = arith.constant 0 : i32
    %c0_i32_0 = arith.constant 0 : i32
    %c0_i32_1 = arith.constant 0 : i32
    return %c0_i32, %c0_i32_0 : i32, i32
  }
  func.func @transform_5(%arg0: i32) -> (i32, i32) {
    %c0_i32 = arith.constant 0 : i32
    %c0_i32_0 = arith.constant 0 : i32
    %c0_i32_1 = arith.constant 0 : i32
    return %c0_i32, %c0_i32_0 : i32, i32
  }
  func.func @transform_6(%arg0: i32) -> (i32, i32) {
    %c0_i32 = arith.constant 0 : i32
    %c0_i32_0 = arith.constant 0 : i32
    return %c0_i32, %arg0 : i32, i32
  }
}

</mosaic_0001>

<bundles_post_ra>
// kernel: tpu_custom_call.1
= control target key start
LH: loop header
LB: loop body
LE: loop exit
PB: predicated region body
PF: predicated region fallthrough
CT: control target
= control target key end

     0   :  { %s1137_s0 = inlined_call_operand.hbm [shape: f32[64,256], index: 0, kind: input, shape index: {}]   ;;  %s1138_s1 = inlined_call_operand.vmem [shape: f32[32,64], index: 1, kind: input, shape index: {}]   ;;  %s1139_s2 = inlined_call_operand.vmem [shape: f32[32,1], index: 2, kind: input, shape index: {}]   ;;  %s1140_s3 = inlined_call_operand.vmem [shape: f32[32,32], index: 3, kind: input, shape index: {}]   ;;  %s1141_s4 = inlined_call_operand.vmem [shape: f32[32,1], index: 4, kind: input, shape index: {}]   ;;  %s1142_s5 = inlined_call_operand.<no memory space> [shape: f32[1,1], index: 5, kind: input, shape index: {}]   ;;  %s1143_s6 = inlined_call_operand.hbm [shape: f32[1,256], index: 6, kind: output, shape index: {}]  }
   0x1   :  { %v11_v0 = vstv %s1142_s5 }
   0x2   :  { %12 = vst [vmem:[#allocation2] sm:$0x1] %v11_v0 }
   0x3   :  { %13 = vsyncpa [#allocation4], 0 }
   0x4   :  { %15 = vsyncpa [#allocation4 + $0x1], 0 }
   0x5   :  { %16 = vsyncpa [#allocation5], 0 }
   0x6   :  { %18 = vsyncpa [#allocation5 + $0x1], 0  ;;  %s928_s23 = smov 0   ;;  %s930_s24 = smov 0  }
   0x7   :  { %s932_s25 = smov 0   ;;  %s934_s26 = smov 0  }
   0x8 LB: > { %s949_s5 = sadd.s32 4294967295, %s882_s26   ;;  %s660_s27 = sadd.s32 4294967294, %s882_s26   ;;  %s882_s26 = sphi %s934_s26, %s1159_s26   ;;  %s878_s25 = sphi %s932_s25, %s1158_s25   ;;  %s874_s24 = sphi %s930_s24, %s1157_s24   ;;  %s870_s23 = sphi %s928_s23, %s1156_s23  }
   0x9   : > { %s953_s28 = sadd.s32 1, %s882_s26   ;;  %s31_s29 = sadd.s32 1, %s878_s25 }
   0xa   : > { %s28_s30 = ssub.s32 %s882_s26, %s953_s28  ;;  %p38_p0 = scmp.ne.s32.totalorder %s878_s25, %s874_s24 }
   0xb   : > { %p29_p1 = scmp.eq.s32.totalorder %s28_s30, 0  ;;  %p39_p2 = scmp.eq.s32.totalorder %s882_s26, 0 }
   0xc   : > { %p44_p3 = scmp.ne.s32.totalorder %s874_s24, %s870_s23  ;;  %p45_p4 = scmp.eq.s32.totalorder %s949_s5, 0 }
   0xd   : > { %s965_s7 = scalar_select %p29_p1, %s878_s25, %s31_s29  }
   0xe   : > { %p967_p5 = por %p39_p2, %p38_p0  ;;  %p971_p6 = por %p45_p4, %p44_p3 }
   0xf   : > { %p173_p7 = scmp.eq.s32.totalorder %s949_s5, 1  ;;  %p179_p8 = scmp.eq.s32.totalorder %s660_s27, 1 }
  0x10   : > { %s1147_s9 = scalar_select %p971_p6, 1, 0 }
  0x11   : > { %p746_p10 = scmp.lt.s32.totalorder %s882_s26, 2  ;;  %p978_p11 = por %p173_p7, %p38_p0 }
  0x12   : > { %p982_p12 = por %p179_p8, %p44_p3  ;;  %s214_s12 = sand.u32 1, %s878_s25  }
  0x13   : > { %s1148_s10 = scalar_select %p978_p11, 1, 0 }
  0x14   : > { %s1149_s11 = scalar_select %p982_p12, 1, 0 }
  0x15   : > { %s664_s13 = sshll.u32 %s882_s26, 7  ;;  %s663_s14 = sshll.u32 %s214_s12, 6 }
  0x16   : > { %s991_s17 = scalar_lea.hbm %s1137_s0, %s664_s13  ;;  %s218_s18 = scalar_lea.vmem [#allocation3], %s663_s14 }
  0x17   : > { %s224_s19 = sshll.u32 %s218_s18, 4  ;;  %p995_p13 = pnand %p746_p10, %p967_p5  ;;  %s999_s19 = int_to_ptr.vmem [resolvable:$true] %s224_s19 }
  0x18   : > { %s1002_s21 = scalar_lea.sflag [#allocation4], %s214_s12  ;;  %s790_s22 = scalar_lea.hbm %s991_s17, 1024 }
  0x19   : > { %p791_p1 = scmp.ne.s32.totalorder %s991_s17, %s790_s22  ;;  %p792_p2 = pneg %p995_p13 }
  0x1a   : > { %s795_s30 = scalar_lea.hbm %s1137_s0, 2048  ;;  %p796_p5 = scmp.lt.s32.totalorder %s991_s17, %s1137_s0 }
  0x1b   : > { %p793_p3 = pnand %p792_p2, %p791_p1  ;;  %p797_p7 = scmp.lt.s32.totalorder %s795_s30, %s790_s22 }
  0x1d   : > { %p794_p4 = pneg %p793_p3  ;;  %p798_p8 = por %p797_p7, %p796_p5 }
  0x1f   : > { %p799_p10 = pnand %p798_p8, %p794_p4 }
  0x21   : > { %802 = shalt.err (!%p799_p10)
}
  0x22   : > { %s803_s12 = scalar_lea.vmem %s999_s19, 1024  ;;  %s884_s14 = smov [#allocation3]  }
  0x23   : > { %p804_p9 = scmp.ne.s32.totalorder %s999_s19, %s803_s12  ;;  %s808_s15 = sshll.u32 %s884_s14, 4  ;;  %s809_s15 = int_to_ptr.vmem [resolvable:$false] %s808_s15 }
  0x24   : > { %s810_s16 = scalar_lea.vmem %s809_s15, 2048  ;;  %p811_p3 = scmp.lt.s32.totalorder %s999_s19, %s809_s15 }
  0x25   : > { %p806_p0 = pnand %p804_p9, %p792_p2  ;;  %p812_p12 = scmp.lt.s32.totalorder %s810_s16, %s803_s12 }
  0x27   : > { %p807_p1 = pneg %p806_p0  ;;  %p813_p11 = por %p812_p12, %p811_p3 }
  0x29   : > { %p814_p6 = pnand %p813_p11, %p807_p1 }
  0x2b   : > { %817 = shalt.err (!%p814_p6)
}
  0x2c   : > { %s885_s18 = smov 256   ;;  %s886_s22 = smov 128  }
  0x2d   : > { %s887_s27 = smov 8   ;;  %p232_p9 = scmp.lt.s32.totalorder %s882_s26, 3 }
  0x2e   : > { %741 = dma.hbm_to_vmem [thread:$0]  (!%p995_p13), %s991_s17, 1024, %s999_s19, %s1002_s21, %s885_s18, %s886_s22, %s887_s27  }
  0x2f   : > { %p1151_p0 = scmp.ge.s32.totalorder %s882_s26, 1 }
  0x31   : > { %p233_p2 = pnand %p1151_p0, %p232_p9 }
  0x32   : > { %s1027_s29 = sand.u32 (!%p233_p2), 1, %s874_s24   ;;  %p1152_p6 = scmp.ne.s32.totalorder (!%p233_p2), %s1147_s9, 0 }
  0x33   : > { %236 = sbr.rel (%p233_p2) target bundleno = 552 (0x228), region = 44  ;;  %s666_s30 = sshll.u32 (!%p233_p2), %s1027_s29, 6 }
  0x34   : > { %s239_s8 = scalar_lea.sflag (!%p233_p2), [#allocation4], %s1027_s29  ;;  %s1031_s13 = scalar_lea.vmem (!%p233_p2), [#allocation3], %s666_s30 }
  0x38   : > { %861 = dma.done.wait (%p1152_p6), %s239_s8, 1024  }
  0x39   : > { %863 = vsyncadd (%p1152_p6), %s239_s8, 4294966272  ;;  %v888_v1 = vmov 0   ;;  %v281_v2 = vld [vmem:[%s1031_s13 + $0x38] sm:$0xff]  ;;  %v280_v3 = vld [vmem:[%s1031_s13 + $0x30] sm:$0xff]  ;;  %vm306_vm0 = vcmask 523264   ;;  %vm458_vm1 = vcmask 261120  }
  0x3a   : > { %784 = vset.pattern.permute.xlu0 %v888_v1  ;;  %785 = vset.pattern.permute.xlu1 %v888_v1  ;;  %v279_v4 = vld [vmem:[%s1031_s13 + $0x28] sm:$0xff]  ;;  %v270_v5 = vld [vmem:[%s1138_s1] sm:$0xff]  ;;  %v285_v10 = vld [vmem:[%s1139_s2 + $0x18] sm:$0xff]  ;;  %s675_s20 = sshll.u32 %s949_s5, 4  ;;  %s269_s21 = scalar_lea.vmem [#allocation6], %s1027_s29 }
  0x3b   : > { %698 = vmatprep.subr.mxu0 %v281_v2  ;;  %714 = vmatprep.mubr.msk.f32.mxu0 %vm306_vm0, %v270_v5  ;;  %v278_v6 = vld [vmem:[%s1031_s13 + $0x20] sm:$0xff]  ;;  %v284_v7 = vld [vmem:[%s1139_s2 + $0x10] sm:$0xff]  ;;  %v277_v9 = vld [vmem:[%s1031_s13 + $0x18] sm:$0xff]  ;;  %s594_s12 = sshll.u32 %s269_s21, 4  ;;  %s582_s16 = scalar_lea.sflag [#allocation5], %s1027_s29  ;;  %s595_s12 = int_to_ptr.vmem [resolvable:$true] %s594_s12 }
  0x3c   : > { %699 = vmatpush3.msra.mxu0 %v281_v2  ;;  %298 = vperm.xlu0 %784, %v284_v7   ;;  %v282_v8 = vld [vmem:[%s1139_s2] sm:$0xff]  ;;  %v283_v11 = vld [vmem:[%s1139_s2 + $0x8] sm:$0xff]  ;;  %v276_v12 = vld [vmem:[%s1031_s13 + $0x10] sm:$0xff]  ;;  %s818_s18 = scalar_lea.vmem %s595_s12, 16  ;;  %p1153_p12 = scmp.ne.s32.totalorder %s1148_s10, 0 }
  0x3d   : > { %700 = vmatprep.subr.mxu0 %v280_v3  ;;  %288 = vperm.xlu1 %785, %v282_v8   ;;  %v275_v13 = vld [vmem:[%s1031_s13 + $0x8] sm:$0xff]  ;;  %v434_v14 = vld [vmem:[%s1141_s4] sm:$0xff]  ;;  %v437_v20 = vld [vmem:[%s1141_s4 + $0x18] sm:$0xff]  ;;  %p819_p11 = scmp.ne.s32.totalorder %s595_s12, %s818_s18  ;;  %s889_s22 = smov [#allocation6]  }
  0x3e   : > { %701 = vmatpush3.msra.mxu0 %v280_v3  ;;  %v435_v15 = vld [vmem:[%s1141_s4 + $0x8] sm:$0xff]  ;;  %v436_v18 = vld [vmem:[%s1141_s4 + $0x10] sm:$0xff]  ;;  %v273_v21 = vld [vmem:[%s1138_s1 + $0x18] sm:$0xff]  ;;  %s822_s27 = sshll.u32 %s889_s22, 4  ;;  %s823_s27 = int_to_ptr.vmem [resolvable:$false] %s822_s27 }
  0x3f   : > { %702 = vmatprep.subr.mxu0 %v279_v4  ;;  %v274_v16 = vld [vmem:[%s1031_s13] sm:$0xff]  ;;  %v272_v19 = vld [vmem:[%s1138_s1 + $0x10] sm:$0xff]  ;;  %v569_v22 = vld [vmem:[#allocation2] sm:$0x1]  ;;  %s592_s13 = scalar_lea.hbm %s1143_s6, %s675_s20  ;;  %p820_p13 = pnand %p819_p11, %p1153_p12 }
  0x40   : > { %703 = vmatpush3.msra.mxu0 %v279_v4  ;;  %303 = vperm.xlu0 %784, %v285_v10   ;;  %v271_v17 = vld [vmem:[%s1138_s1 + $0x8] sm:$0xff]  ;;  %v430_v23 = vld [vmem:[%s1140_s3] sm:$0xff]  ;;  %v432_v63 = vld [vmem:[%s1140_s3 + $0x10] sm:$0xff]  ;;  %s824_s5 = scalar_lea.vmem %s823_s27, 32  ;;  %p825_p5 = scmp.lt.s32.totalorder %s595_s12, %s823_s27 }
  0x41   : > { %704 = vmatprep.subr.mxu0 %v278_v6  ;;  %293 = vperm.xlu1 %785, %v283_v11   ;;  %v431_v62 = vld [vmem:[%s1140_s3 + $0x8] sm:$0xff]  ;;  %v433_v0 = vld [vmem:[%s1140_s3 + $0x18] sm:$0xff]  ;;  %p821_p4 = pneg %p820_p13  ;;  %p826_p7 = scmp.lt.s32.totalorder %s824_s5, %s818_s18 }
  0x42   : > { %705 = vmatpush3.msra.mxu0 %v278_v6  ;;  %728 = vmatprep.mubr.msk.f32.mxu1 %vm458_vm1, %v430_v23 }
  0x43   : > { %706 = vmatprep.subr.mxu0 %v277_v9  ;;  %p827_p8 = por %p826_p7, %p825_p5 }
  0x44   : > { %707 = vmatpush3.msra.mxu0 %v277_v9  ;;  %440 = vperm.xlu0 %784, %v434_v14  }
  0x45   : > { %708 = vmatprep.subr.mxu0 %v276_v12  ;;  %445 = vperm.xlu1 %785, %v435_v15   ;;  %p828_p10 = pnand %p827_p8, %p821_p4 }
  0x46   : > { %709 = vmatpush3.msra.mxu0 %v276_v12 }
  0x47   : > { %710 = vmatprep.subr.mxu0 %v275_v13 }
  0x48   : > { %711 = vmatpush3.msra.mxu0 %v275_v13  ;;  %450 = vperm.xlu0 %784, %v436_v18  }
  0x49   : > { %712 = vmatprep.subr.mxu0 %v274_v16  ;;  %455 = vperm.xlu1 %785, %v437_v20  }
  0x4a   : > { %713 = vmatpush3.msra.mxu0 %v274_v16 }
  0x4b   : > { %715 = vmatmul.mubr.msk.f32.vlgmr.msra.gmra.mxu0 %vm306_vm0, %v271_v17 }
  0x4c   : > { %717 = vmatprep.mubr.msk.f32.mxu0 %vm306_vm0, %v272_v19  ;;  %572 = vperm.xlu0 %784, %v569_v22   ;;  %v575_v19 = vlaneseq }
  0x4e   : > { %v576_v22 = vshrl.u32 %v575_v19, 7 }
  0x4f   : > { %718 = vmatmul.mubr.msk.f32.gmra.mxu0 %vm306_vm0, %v273_v21 }
  0xb7   : > { %v299_v25 = vpop.permute.xlu0 %298 }
  0xb8   : > { %v289_v24 = vpop.permute.xlu1 %288 }
  0xbb   : > { %v304_v31 = vpop.permute.xlu0 %303 }
  0xbc   : > { %v294_v26 = vpop.permute.xlu1 %293 }
  0xbf   : > { %v441_v1 = vpop.permute.xlu0 %440 }
  0xc0   : > { %v446_v2 = vpop.permute.xlu1 %445 }
  0xc3   : > { %v451_v8 = vpop.permute.xlu0 %450 }
  0xc4   : > { %v456_v10 = vpop.permute.xlu1 %455 }
 0x10b   : > { %v716_v27 = vpop.f32.mrf.mxu0 }
 0x10c   : > { %v391_v28 = vadd.f32 %v716_v27, %v294_v26  ;;  %v573_v27 = vpop.permute.xlu0 %572 }
 0x10d   : > { %v385_v29 = vpop.f32.mrf.mxu0 }
 0x10e   : > { %v386_v30 = vadd.f32 %v385_v29, %v289_v24  ;;  %v405_v33 = vmul.f32 %v391_v28, %v391_v28 }
 0x10f   : > { %v719_v32 = vpop.f32.mrf.mxu0 }
 0x110   : > { %v404_v34 = vmul.f32 %v386_v30, %v386_v30  ;;  %v401_v35 = vadd.f32 %v719_v32, %v304_v31 }
 0x111   : > { %v395_v36 = vpop.f32.mrf.mxu0 }
 0x112   : > { %v406_v37 = vadd.f32 %v405_v33, %v404_v34  ;;  %v396_v38 = vadd.f32 %v395_v36, %v299_v25  ;;  %v416_v40 = vmul.f32 %v401_v35, %v401_v35  ;;  %v577_v25 = vsub.s32 0, %v576_v22 }
 0x114   : > { %v407_v39 = vrot.slane %v406_v37, 4  ;;  %v415_v41 = vmul.f32 %v396_v38, %v396_v38  ;;  %v578_v29 = vrot.slane %v573_v27, %v577_v25 }
 0x116   : > { %v408_v42 = vadd.f32 %v407_v39, %v406_v37  ;;  %v417_v43 = vadd.f32 %v416_v40, %v415_v41 }
 0x118   : > { %v409_v44 = vrot.slane %v408_v42, 2  ;;  %v418_v45 = vrot.slane %v417_v43, 4 }
 0x11a   : > { %v410_v46 = vadd.f32 %v409_v44, %v408_v42  ;;  %v419_v47 = vadd.f32 %v418_v45, %v417_v43 }
 0x11c   : > { %v411_v48 = vrot.slane %v410_v46, 1  ;;  %v420_v49 = vrot.slane %v419_v47, 2 }
 0x11e   : > { %v421_v50 = vadd.f32 %v420_v49, %v419_v47  ;;  %v412_v51 = vadd.f32 %v411_v48, %v410_v46 }
 0x120   : > { %v422_v52 = vrot.slane %v421_v50, 1  ;;  %v413_v54 = vmax.f32 %v412_v51, 1e-24 }
 0x122   : > { %v423_v53 = vadd.f32 %v422_v52, %v421_v50 }
 0x124   : > { %v424_v55 = vmax.f32 %v423_v53, 1e-24 }
 0x126   : > { %786 = vrsqrt.f32 %v424_v55 }
 0x127   : > { %788 = vrsqrt.f32 %v413_v54 }
 0x133   : > { %v787_v56 = vpop.eup %786 }
 0x134   : > { %v429_v57 = vmul.f32 %v787_v56, %v401_v35  ;;  %v789_v58 = vpop.eup %788  ;;  %v428_v59 = vmul.f32 %v787_v56, %v396_v38 }
 0x135   : > { %v427_v60 = vmul.f32 %v789_v58, %v391_v28  ;;  %v426_v61 = vmul.f32 %v789_v58, %v386_v30 }
 0x136   : > { %720 = vmatprep.subr.mxu1 %v429_v57 }
 0x137   : > { %721 = vmatpush3.msra.mxu1 %v429_v57 }
 0x138   : > { %722 = vmatprep.subr.mxu1 %v428_v59 }
 0x139   : > { %723 = vmatpush3.msra.mxu1 %v428_v59 }
 0x13a   : > { %724 = vmatprep.subr.mxu1 %v427_v60 }
 0x13b   : > { %725 = vmatpush3.msra.mxu1 %v427_v60 }
 0x13c   : > { %726 = vmatprep.subr.mxu1 %v426_v61 }
 0x13d   : > { %727 = vmatpush3.msra.mxu1 %v426_v61 }
 0x13e   : > { %729 = vmatmul.mubr.msk.f32.vlgmr.msra.gmra.mxu1 %vm458_vm1, %v431_v62 }
 0x13f   : > { %731 = vmatprep.mubr.msk.f32.mxu1 %vm458_vm1, %v432_v63 }
 0x142   : > { %732 = vmatmul.mubr.msk.f32.gmra.mxu1 %vm458_vm1, %v433_v0 }
 0x1fe   : > { %v730_v3 = vpop.f32.mrf.mxu1 }
 0x1ff   : > { %v543_v5 = vadd.f32 %v730_v3, %v446_v2 }
 0x200   : > { %v537_v4 = vpop.f32.mrf.mxu1 }
 0x201   : > { %v538_v6 = vadd.f32 %v537_v4, %v441_v1  ;;  %v557_v12 = vmul.f32 %v543_v5, %v427_v60 }
 0x202   : > { %v733_v7 = vpop.f32.mrf.mxu1 }
 0x203   : > { %v556_v9 = vmul.f32 %v538_v6, %v426_v61  ;;  %v553_v13 = vadd.f32 %v733_v7, %v456_v10 }
 0x204   : > { %v547_v11 = vpop.f32.mrf.mxu1 }
 0x205   : > { %v548_v14 = vadd.f32 %v547_v11, %v451_v8  ;;  %v560_v15 = vadd.f32 %v557_v12, %v556_v9  ;;  %v559_v17 = vmul.f32 %v553_v13, %v429_v57 }
 0x207   : > { %v558_v16 = vmul.f32 %v548_v14, %v428_v59 }
 0x209   : > { %v561_v18 = vadd.f32 %v560_v15, %v558_v16 }
 0x20b   : > { %v562_v20 = vadd.f32 %v561_v18, %v559_v17 }
 0x20d   : > { %v563_v21 = vrot.slane %v562_v20, 4 }
 0x20f   : > { %v564_v23 = vadd.f32 %v563_v21, %v562_v20 }
 0x211   : > { %v565_v24 = vrot.slane %v564_v23, 2 }
 0x213   : > { %v566_v26 = vadd.f32 %v565_v24, %v564_v23 }
 0x215   : > { %v567_v28 = vrot.slane %v566_v26, 1 }
 0x217   : > { %v568_v30 = vadd.f32 %v567_v28, %v566_v26 }
 0x219   : > { %v579_v31 = vadd.f32 %v578_v29, %v568_v30 }
 0x21b   : > { %580 = vst [vmem:[%s269_s21] sm:$0x1] %v579_v31 }
 0x21c   : > { %831 = shalt.err (!%p828_p10)
}
 0x21d   : > { %s832_s30 = scalar_lea.hbm %s592_s13, 16  ;;  %s836_s17 = scalar_lea.hbm %s1143_s6, 32 }
 0x21e   : > { %p833_p1 = scmp.ne.s32.totalorder %s592_s13, %s832_s30  ;;  %p837_p0 = scmp.lt.s32.totalorder %s592_s13, %s1143_s6 }
 0x21f   : > { %p838_p2 = scmp.lt.s32.totalorder %s836_s17, %s832_s30 }
 0x220   : > { %p834_p3 = pnand %p833_p1, %p1153_p12 }
 0x221   : > { %p839_p6 = por %p838_p2, %p837_p0 }
 0x222   : > { %p835_p9 = pneg %p834_p3 }
 0x224   : > { %p840_p11 = pnand %p839_p6, %p835_p9 }
 0x226   : > { %843 = shalt.err (!%p840_p11)
}
 0x227   : > { %736 = dma.vmem_to_hbm [thread:$0]  (%p1153_p12), %s595_s12, 16, %s592_s13, %s582_s16  }
 0x228 PF: > { %s606_s20 = sand.u32 1, %s870_s23   ;;  %p1154_p13 = scmp.ne.s32.totalorder %s1149_s11, 0 }
 0x229   : > { %p1155_p4 = scmp.ge.s32.totalorder %s882_s26, 2  ;;  %s607_s21 = scalar_lea.sflag [#allocation5], %s606_s20 }
 0x22b   : > { %p743_p5 = pnand %p1155_p4, %p1154_p13 }
 0x22d   : > { %p744_p7 = pneg %p743_p5 }
 0x22f   : > { %865 = dma.done.wait (%p744_p7), %s607_s21, 16  }
 0x230   : > { %867 = vsyncadd (%p744_p7), %s607_s21, 4294967280  ;;  %p21_p8 = scmp.ge.s32.totalorder %s953_s28, 4   ;;  %s1156_s23 = smov %s874_s24 }
 0x231   : > { %s1157_s24 = smov %s878_s25  ;;  %s1158_s25 = smov %s965_s7 }
 0x232   : > { %s1159_s26 = smov %s953_s28  ;;  %23 = sbr.rel (!%p21_p8) target bundleno = 8 (0x8), region = 89 }
 0x237   :  { %611 = vsyncpa [#allocation4], 1 }
 0x238   :  { %613 = vsyncpa [#allocation4 + $0x1], 1 }
 0x239   :  { %614 = vsyncpa [#allocation5], 1 }
 0x23a   :  { %616 = vsyncpa [#allocation5 + $0x1], 1 }

</bundles_post_ra>
